<compile_context>
chip_gen: v7x
topology: tpu7x:2x2x1
jax: 0.10.0
libtpu: 0.0.40
codegen_flags: <defaults>
</compile_context>

<pallas_src>
import math

import jax
import jax.numpy as jnp
from jax.experimental import pallas as pl
from jax.experimental.pallas import tpu as pltpu


def _round_up(x, m):
    return (x + m - 1) // m * m


def _token_embed_kernel(x_ref, w_ref, o_ref):
    # x_ref: (TM, 3*c_in) im2col tile  [x[t-1] | x[t] | x[t+1]]
    # w_ref: (3*c_in, TN) stacked-weight slice (VMEM-resident across rows)
    # o_ref: (TM, TN) lane-dense output tile
    o_ref[...] = jnp.dot(
        x_ref[...], w_ref[...], preferred_element_type=jnp.float32
    ).astype(o_ref.dtype)


def token_embedding(x, weight, *, tm=512, tn=2048):
    """TokenEmbedding forward pass.

    x:      (B, L, c_in)        -- layout the PyTorch module receives in forward()
    weight: (d_model, c_in, 3)  -- PyTorch Conv1d weight layout (OIH)
    returns (B, L, d_model)
    """
    B, L, c_in = x.shape
    d_model = weight.shape[0]
    M = B * L
    K = 3 * c_in

    # Circular im2col along L (per-batch roll; only c_in-wide copies).
    # Conv1d is cross-correlation: tap k=0 pairs with x[t-1], k=1 with x[t],
    # k=2 with x[t+1] (circular padding=1).
    x_prev = jnp.roll(x, 1, axis=1)
    x_next = jnp.roll(x, -1, axis=1)
    x_cat = jnp.concatenate([x_prev, x, x_next], axis=-1).reshape(M, K)

    # Stacked weight: w_stacked[k*c_in + i, o] = weight[o, i, k]
    w_stacked = jnp.transpose(weight, (2, 1, 0)).reshape(K, d_model)

    # Tile sizing.
    TM = min(tm, _round_up(M, 8))          # multiple of 8 sublanes
    M_pad = _round_up(M, TM)
    TN = min(tn, _round_up(d_model, 128))  # multiple of 128 lanes
    N_pad = _round_up(d_model, TN)

    if M_pad != M:
        x_cat = jnp.pad(x_cat, ((0, M_pad - M), (0, 0)))
    if N_pad != d_model:
        w_stacked = jnp.pad(w_stacked, ((0, 0), (0, N_pad - d_model)))

    cost = pl.CostEstimate(
        flops=2 * M * K * d_model,
        transcendentals=0,
        bytes_accessed=4 * (M * K + K * N_pad + M * d_model),
    )

    out = pl.pallas_call(
        _token_embed_kernel,
        out_shape=jax.ShapeDtypeStruct((M_pad, N_pad), x.dtype),
        grid=(M_pad // TM, N_pad // TN),
        in_specs=[
            pl.BlockSpec((TM, K), lambda i, j: (i, 0)),
            pl.BlockSpec((K, TN), lambda i, j: (0, j)),
        ],
        out_specs=pl.BlockSpec((TM, TN), lambda i, j: (i, j)),
        compiler_params=pltpu.CompilerParams(
            dimension_semantics=("parallel", "parallel"),
        ),
        cost_estimate=cost,
    )(x_cat, w_stacked)

    return out[:M, :d_model].reshape(B, L, d_model)


def _reference(x, weight):
    """Pure-JAX reference of the PyTorch forward (circular Conv1d, no bias)."""
    x_ncl = jnp.transpose(x, (0, 2, 1))                        # (B, c_in, L)
    x_pad = jnp.pad(x_ncl, ((0, 0), (0, 0), (1, 1)), mode="wrap")
    out = jax.lax.conv_general_dilated(
        x_pad, weight,
        window_strides=(1,), padding="VALID",
        dimension_numbers=("NCH", "OIH", "NCH"),
    )
    return jnp.transpose(out, (0, 2, 1))                       # (B, L, d_model)


if __name__ == "__main__":
    B, L, c_in, d_model = 2, 8, 4, 32

    key = jax.random.PRNGKey(0)
    kx, kw = jax.random.split(key)

    x = jax.random.normal(kx, (B, L, c_in), dtype=jnp.float32)

    # kaiming_normal_(mode='fan_in', nonlinearity='leaky_relu'):
    #   fan_in = c_in * kernel_size; gain = sqrt(2 / (1 + 0.01**2)); std = gain / sqrt(fan_in)
    fan_in = c_in * 3
    gain = math.sqrt(2.0 / (1.0 + 0.01 ** 2))
    std = gain / math.sqrt(fan_in)
    weight = std * jax.random.normal(kw, (d_model, c_in, 3), dtype=jnp.float32)

    out = jax.block_until_ready(token_embedding(x, weight))
    ref = jax.block_until_ready(_reference(x, weight))

    assert out.shape == (B, L, d_model)
    assert jnp.allclose(out, ref, atol=1e-5, rtol=1e-5)

    print("KERNEL_OK")
</pallas_src>

<mosaic_0001>
module attributes {stable_mosaic.version = 11 : i64} {
  func.func @_token_embed_kernel(%arg0: i32, %arg1: i32, %arg2: memref<16x12xf32, #tpu.memory_space<vmem>>, %arg3: memref<12x128xf32, #tpu.memory_space<vmem>>, %arg4: memref<16x128xf32, #tpu.memory_space<vmem>>) attributes {dimension_semantics = [#tpu.dimension_semantics<parallel>, #tpu.dimension_semantics<parallel>], iteration_bounds = array<i64: 1, 1>, scalar_prefetch = 0 : i64, scratch_operands = 0 : i64, tpu.core_type = #tpu.core_type<tc>, window_params = [{transform_indices = @transform_0, window_bounds = array<i64: 16, 12>}, {transform_indices = @transform_1, window_bounds = array<i64: 12, 128>}, {transform_indices = @transform_2, window_bounds = array<i64: 16, 128>}]} {
    %c0 = arith.constant 0 : index
    %c0_0 = arith.constant 0 : index
    %0 = vector.load %arg2[%c0, %c0_0] : memref<16x12xf32, #tpu.memory_space<vmem>>, vector<16x12xf32>
    %c0_1 = arith.constant 0 : index
    %c0_2 = arith.constant 0 : index
    %1 = vector.load %arg3[%c0_1, %c0_2] : memref<12x128xf32, #tpu.memory_space<vmem>>, vector<12x128xf32>
    %cst = arith.constant dense<0.000000e+00> : vector<16x128xf32>
    %2 = tpu.matmul %0, %1, %cst {dimension_numbers = #tpu.dot_dimension_numbers<[1], [0], [0], [1], [0, 0, 1, 1], [], []>} : vector<16x12xf32>, vector<12x128xf32>, vector<16x128xf32> -> vector<16x128xf32>
    %c0_3 = arith.constant 0 : index
    %c0_4 = arith.constant 0 : index
    %3 = vector.load %arg4[%c0_3, %c0_4] : memref<16x128xf32, #tpu.memory_space<vmem>>, vector<16x128xf32>
    tpu.vector_store %arg4[%c0_3, %c0_4], %2 {strides = array<i32>} : memref<16x128xf32, #tpu.memory_space<vmem>>, vector<16x128xf32>,
    return
  }
  func.func @transform_0(%arg0: i32, %arg1: i32) -> (i32, i32) {
    %c0_i32 = arith.constant 0 : i32
    %c0_i32_0 = arith.constant 0 : i32
    return %arg0, %c0_i32 : i32, i32
  }
  func.func @transform_1(%arg0: i32, %arg1: i32) -> (i32, i32) {
    %c0_i32 = arith.constant 0 : i32
    %c0_i32_0 = arith.constant 0 : i32
    return %c0_i32, %arg1 : i32, i32
  }
  func.func @transform_2(%arg0: i32, %arg1: i32) -> (i32, i32) {
    %c0_i32 = arith.constant 0 : i32
    return %arg0, %arg1 : i32, i32
  }
}

</mosaic_0001>

<bundles_post_ra>
// kernel: tpu_custom_call.1
= control target key start
LH: loop header
LB: loop body
LE: loop exit
PB: predicated region body
PF: predicated region fallthrough
CT: control target
= control target key end

     0   :  { %7 = vsyncpa [#allocation3], 0  ;;  %s314_s0 = inlined_call_operand.hbm [shape: f32[16,12], index: 0, kind: input, shape index: {}]   ;;  %s315_s1 = inlined_call_operand.hbm [shape: f32[12,128], index: 1, kind: input, shape index: {}]   ;;  %s316_s2 = inlined_call_operand.hbm [shape: f32[16,128], index: 2, kind: output, shape index: {}]  }
   0x1   :  { %8 = vsyncpa [#allocation6], 0 }
   0x2   :  { %9 = vsyncpa [#allocation4], 0  ;;  %s248_s9 = smov [#allocation2]   ;;  %s176_s13 = scalar_lea.hbm %s314_s0, 256 }
   0x3   :  { %s15_s10 = sshll.u32 %s248_s9, 4  ;;  %p177_p0 = scmp.ne.s32.totalorder %s314_s0, %s176_s13  ;;  %s16_s10 = int_to_ptr.vmem [resolvable:$true] %s15_s10 }
   0x4   :  { %p180_p1 = scmp.lt.u32.totalorder %s176_s13, %s314_s0 }
   0x6   :  { %p182_p2 = pnand %p180_p1, %p177_p0 }
   0x8   :  { %185 = shalt.err (!%p182_p2)
}
   0x9   :  { %s186_s18 = scalar_lea.vmem %s16_s10, 256  ;;  %p191_p4 = scmp.lt.s32.totalorder %s16_s10, %s16_s10 }
   0xa   :  { %p187_p3 = scmp.ne.s32.totalorder %s16_s10, %s186_s18  ;;  %p192_p5 = scmp.lt.s32.totalorder %s186_s18, %s186_s18 }
   0xc   :  { %p193_p6 = por %p192_p5, %p191_p4 }
   0xe   :  { %p194_p7 = pnand %p193_p6, %p187_p3 }
  0x10   :  { %197 = shalt.err (!%p194_p7)
}
  0x11   :  { %s249_s19 = smov 128   ;;  %s250_s20 = smov 8  }
  0x12   :  { %21 = dma.hbm_to_vmem [thread:$0]  %s314_s0, 256, %s16_s10, [#allocation3], %s249_s19, %s249_s19, %s250_s20  }
  0x13   :  { %s251_s23 = smov [#allocation5]   ;;  %s198_s27 = scalar_lea.hbm %s315_s1, 256 }
  0x14   :  { %s27_s24 = sshll.u32 %s251_s23, 4  ;;  %p199_p8 = scmp.ne.s32.totalorder %s315_s1, %s198_s27  ;;  %s28_s24 = int_to_ptr.vmem [resolvable:$true] %s27_s24 }
  0x15   :  { %p202_p9 = scmp.lt.u32.totalorder %s198_s27, %s315_s1 }
  0x17   :  { %p204_p10 = pnand %p202_p9, %p199_p8 }
  0x19   :  { %207 = shalt.err (!%p204_p10)
}
  0x1a   :  { %s208_s4 = scalar_lea.vmem %s28_s24, 256  ;;  %p213_p12 = scmp.lt.s32.totalorder %s28_s24, %s28_s24 }
  0x1b   :  { %p209_p11 = scmp.ne.s32.totalorder %s28_s24, %s208_s4  ;;  %p214_p13 = scmp.lt.s32.totalorder %s208_s4, %s208_s4 }
  0x1d   :  { %p215_p0 = por %p214_p13, %p213_p12 }
  0x1f   :  { %p216_p1 = pnand %p215_p0, %p209_p11 }
  0x21   :  { %219 = shalt.err (!%p216_p1)
}
  0x22   :  { %33 = dma.hbm_to_vmem [thread:$0]  %s315_s1, 256, %s28_s24, [#allocation6], %s249_s19, %s249_s19, %s250_s20  }
  0x23   :  { %242 = dma.done.wait [#allocation3], 256  }
  0x24   :  { %243 = vsyncadd [#allocation3], 4294967040 }
  0x25   :  { %244 = dma.done.wait [#allocation6], 256  }
  0x26   :  { %245 = vsyncadd [#allocation6], 4294967040  ;;  %vm51_vm0 = vcmask 1043456   ;;  %vm44_vm1 = vcmask 97280   ;;  %vm252_vm2 = vmmov 1   ;;  %v42_v0 = vld [vmem:[#allocation5] sm:$0xff] }
  0x27   :  { %vm165_vm3 = vmpackc.low %vm51_vm0, %vm252_vm2  ;;  %v43_v1 = vld [vmem:[#allocation5 + $0x8] sm:$0xf]  ;;  %v40_v2 = vld [vmem:[#allocation2] sm:$0xff]  ;;  %s253_s6 = smov [#allocation7]  }
  0x28   :  { %v164_v3 = vpack.c.bf16 %v43_v1, %v42_v0  ;;  %161 = vmatprep.mubr.msk.f32.mxu0 %vm44_vm1, %v40_v2  ;;  %v41_v4 = vld [vmem:[#allocation2 + $0x8] sm:$0xff]  ;;  %s137_s7 = sshll.u32 %s253_s6, 4  ;;  %s138_s7 = int_to_ptr.vmem [resolvable:$true] %s137_s7 }
  0x29   :  { %s220_s1 = scalar_lea.vmem %s138_s7, 256  ;;  %p225_p3 = scmp.lt.s32.totalorder %s138_s7, %s138_s7 }
  0x2a   :  { %166 = vmatprep.subr.msk.bf16.mxu0 %vm165_vm3, %v164_v3  ;;  %p221_p2 = scmp.ne.s32.totalorder %s138_s7, %s220_s1  ;;  %p226_p4 = scmp.lt.s32.totalorder %s220_s1, %s220_s1 }
  0x2b   :  { %169 = vmatpush3.bf16.msk.msra.mxu0 %vm165_vm3, %v164_v3 }
  0x2c   :  { %p227_p5 = por %p226_p4, %p225_p3 }
  0x2e   :  { %162 = vmatmul.mubr.msk.f32.vlgmr.msra.gmra.mrb[0].mxu0 %vm44_vm1, %v41_v4  ;;  %p228_p6 = pnand %p227_p5, %p221_p2 }
 0x101   :  { %v163_v5 = vpop.f32.mrb[0].mxu0 }
 0x102   :  { %131 = vst [vmem:[#allocation7 + $0x8] sm:$0xff] %v163_v5  ;;  %v121_v6 = vpop.f32.mrb[1].mxu0 }
 0x103   :  { %130 = vst [vmem:[#allocation7] sm:$0xff] %v121_v6 }
 0x104   :  { %231 = shalt.err (!%p228_p6)
}
 0x105   :  { %s232_s10 = scalar_lea.hbm %s316_s2, 256 }
 0x106   :  { %p233_p7 = scmp.ne.s32.totalorder %s316_s2, %s232_s10  ;;  %p236_p8 = scmp.lt.u32.totalorder %s232_s10, %s316_s2 }
 0x108   :  { %p238_p9 = pnand %p236_p8, %p233_p7 }
 0x10a   :  { %241 = shalt.err (!%p238_p9)
}
 0x10b   :  { %143 = dma.vmem_to_hbm [thread:$0]  %s138_s7, 256, %s316_s2, [#allocation4], %s249_s19, %s249_s19, %s250_s20  }
 0x10c   :  { %246 = dma.done.wait [#allocation4], 256  }
 0x10d   :  { %247 = vsyncadd [#allocation4], 4294967040 }
 0x10e   :  { %147 = vsyncpa [#allocation3], 1 }
 0x10f   :  { %148 = vsyncpa [#allocation6], 1 }
 0x110   :  { %149 = vsyncpa [#allocation4], 1 }

</bundles_post_ra>
